<compile_context>
chip_gen: v7x
topology: tpu7x:2x2x1
jax: 0.10.0
libtpu: 0.0.40
codegen_flags: <defaults>
</compile_context>

<pallas_src>
import functools

import jax
import jax.numpy as jnp
import numpy as np
from jax.experimental import pallas as pl
from jax.experimental.pallas import tpu as pltpu


def _round_up(x, m):
    return ((x + m - 1) // m) * m


# --------------------------------------------------------------------------
# Kernel A: fused forward (pool folded into feature matmul + head) + CE.
# --------------------------------------------------------------------------
def fused_forward_ce_kernel(x_ref, wf_ref, wh_ref, bias_ref, lab_ref,
                            emb_ref, loss_ref):
    # x: (tile_b, C*HW) bf16; wf: (C*HW, D_pad) bf16 with the 1/HW pool scale
    # folded in -> one MXU matmul replaces pool + feature projection.
    emb = jnp.dot(x_ref[...], wf_ref[...],
                  preferred_element_type=jnp.float32)        # (tile_b, D_pad) f32
    emb_ref[...] = emb.astype(emb_ref.dtype)

    logits = jnp.dot(emb.astype(wh_ref.dtype), wh_ref[...],
                     preferred_element_type=jnp.float32)     # (tile_b, NC_pad) f32
    masked = logits + bias_ref[...]                          # -1e30 on padded class lanes
    tb, nc_pad = masked.shape

    row_max = jnp.max(masked, axis=-1, keepdims=True)
    lse = jnp.log(jnp.sum(jnp.exp(masked - row_max), axis=-1, keepdims=True)) + row_max

    labels = lab_ref[...]                                    # (tile_b, 1) int32, -1 = pad row
    class_ids = jax.lax.broadcasted_iota(jnp.int32, (tb, nc_pad), 1)
    # label lanes are always < num_classes, so `masked` equals `logits` there
    # and the raw logits can die right after masking.
    picked = jnp.sum(jnp.where(class_ids == labels, masked, 0.0),
                     axis=-1, keepdims=True)
    ce = jnp.where(labels >= 0, lse - picked, 0.0)           # mask pad rows

    tile_sum = jnp.sum(ce)
    row = jax.lax.broadcasted_iota(jnp.int32, (8, 1), 0)
    loss_ref[...] = jnp.where(row == 0, tile_sum, 0.0)       # per-tile partial sum


def fused_forward_ce(x_nchw, labels, w_feat, w_head, *, tile_b=512,
                     compute_dtype=jnp.bfloat16):
    B, C, H, W = x_nchw.shape
    Cw, D = w_feat.shape
    assert Cw == C
    NC = w_head.shape[1]
    HW = H * W
    K = C * HW

    D_pad = _round_up(D, 128)
    NC_pad = _round_up(NC, 128)

    itemsize = jnp.dtype(compute_dtype).itemsize
    # Keep the double-buffered x tile under ~16 MiB of VMEM (safe on v7x's 64 MiB).
    max_rows = max(8, ((16 << 20) // (2 * K * itemsize)) // 8 * 8)
    tile_b = min(tile_b, max_rows, _round_up(B, 8))
    # Prefer >= 2 grid steps so both v7x TensorCores get work (no-op on v5e/v6e).
    if B > 8 and _round_up(B, tile_b) // tile_b < 2:
        tile_b = _round_up((B + 1) // 2, 8)
    n_tiles = pl.cdiv(B, tile_b)
    B_pad = n_tiles * tile_b

    # Activations go straight in (reshape is free, lane dim K needs no padding);
    # only the batch dim is padded, and only when B is not a tile multiple.
    x = x_nchw.reshape(B, K).astype(compute_dtype)
    if B_pad != B:
        x = jnp.zeros((B_pad, K), compute_dtype).at[:B].set(x)

    # Fold the global average pool into the feature matmul: repeat each channel
    # row HW times and scale by 1/HW so that  pool(x) @ w_feat == x_flat @ wf.
    wf = jnp.zeros((K, D_pad), compute_dtype).at[:, :D].set(
        jnp.repeat(w_feat.astype(jnp.float32) * (1.0 / HW), HW, axis=0
                   ).astype(compute_dtype))
    wh = jnp.zeros((D_pad, NC_pad), compute_dtype).at[:D, :NC].set(
        w_head.astype(compute_dtype))
    class_bias = jnp.where(jnp.arange(NC_pad) < NC, 0.0, -1e30
                           ).astype(jnp.float32).reshape(1, NC_pad)
    lab = jnp.full((B_pad, 1), -1, jnp.int32).at[:B, 0].set(labels.astype(jnp.int32))

    emb_pad, loss_parts = pl.pallas_call(
        fused_forward_ce_kernel,
        out_shape=(jax.ShapeDtypeStruct((B_pad, D_pad), jnp.float32),
                   jax.ShapeDtypeStruct((8 * n_tiles, 1), jnp.float32)),
        grid_spec=pltpu.PrefetchScalarGridSpec(
            num_scalar_prefetch=0,
            grid=(n_tiles,),
            in_specs=[pl.BlockSpec((tile_b, K), lambda i: (i, 0)),
                      pl.BlockSpec((K, D_pad), lambda i: (0, 0)),
                      pl.BlockSpec((D_pad, NC_pad), lambda i: (0, 0)),
                      pl.BlockSpec((1, NC_pad), lambda i: (0, 0)),
                      pl.BlockSpec((tile_b, 1), lambda i: (i, 0))],
            out_specs=(pl.BlockSpec((tile_b, D_pad), lambda i: (i, 0)),
                       pl.BlockSpec((8, 1), lambda i: (i, 0))),
        ),
        compiler_params=pltpu.CompilerParams(
            dimension_semantics=("parallel",),
            vmem_limit_bytes=48 * 1024 * 1024),
    )(x, wf, wh, class_bias, lab)

    loss = jnp.sum(loss_parts) / B               # global batch size, not tile size
    emb = emb_pad if B_pad == B else emb_pad[:B]
    return emb, loss                             # emb: (B, D_pad), lanes >= D are zero


# --------------------------------------------------------------------------
# Kernel B: fused L2-normalize + density.fit (mean + unbiased covariance),
#           accumulated into resident mean/cov output blocks. The normalized
#           embeddings themselves are never materialized (caller discards them).
# --------------------------------------------------------------------------
def normalize_fit_kernel(x_ref, mean_ref, cov_ref, *, n_valid):
    i = pl.program_id(0)

    @pl.when(i == 0)
    def _():
        mean_ref[...] = jnp.zeros_like(mean_ref)
        cov_ref[...] = jnp.zeros_like(cov_ref)

    x = x_ref[...].astype(jnp.float32)                       # (tile_n, D_pad)
    sumsq = jnp.sum(x * x, axis=-1, keepdims=True)
    inv_norm = jax.lax.rsqrt(jnp.maximum(sumsq, 1e-24))      # == 1/max(||x||, 1e-12) (torch eps)
    xn = x * inv_norm                                        # zero-padded rows stay 0

    mean_ref[...] += jnp.sum(xn, axis=0, keepdims=True)      # running sum (finalized below)
    cov_ref[...] += jax.lax.dot_general(                     # gram, contracting on axis 0
        xn, xn, dimension_numbers=(((0,), (0,)), ((), ())),
        preferred_element_type=jnp.float32)

    @pl.when(i == pl.num_programs(0) - 1)
    def _():
        # One-pass covariance is OK here because rows are L2-normalized (bounded).
        # n_valid == 1 gives inf/NaN, matching torch.cov's degenerate behavior.
        n = jnp.float32(n_valid)
        mu = mean_ref[...] / n                               # (1, D_pad)
        mean_ref[...] = mu
        cov_ref[...] = (cov_ref[...] - n * (mu.T * mu)) / (n - 1.0)


def normalize_and_fit(x, *, tile_n=2048):
    N, Dp = x.shape
    tile_n = min(tile_n, _round_up(N, 8))
    n_tiles = pl.cdiv(N, tile_n)
    N_pad = n_tiles * tile_n

    xp = x.astype(jnp.float32)
    if N_pad != N:                                           # pad rows are harmless (stay zero)
        xp = jnp.zeros((N_pad, Dp), jnp.float32).at[:N].set(xp)

    kernel = functools.partial(normalize_fit_kernel, n_valid=N)
    mean_p, cov_p = pl.pallas_call(
        kernel,
        out_shape=(jax.ShapeDtypeStruct((1, Dp), jnp.float32),
                   jax.ShapeDtypeStruct((Dp, Dp), jnp.float32)),
        grid_spec=pltpu.PrefetchScalarGridSpec(
            num_scalar_prefetch=0,
            grid=(n_tiles,),
            in_specs=[pl.BlockSpec((tile_n, Dp), lambda i: (i, 0))],
            out_specs=(pl.BlockSpec((1, Dp), lambda i: (0, 0)),
                       pl.BlockSpec((Dp, Dp), lambda i: (0, 0))),
        ),
        compiler_params=pltpu.CompilerParams(
            dimension_semantics=("arbitrary",),
            vmem_limit_bytes=48 * 1024 * 1024),
    )(xp)

    return mean_p[0], cov_p


# --------------------------------------------------------------------------
# Host-side orchestration mirroring DNE.forward / DNE.training_epoch.
# --------------------------------------------------------------------------
def dne_forward(inputs, labels, w_feat, w_head, strong_augmentation=True):
    # Single fused forward over the full batch: the "no-strong-aug" features used
    # for one_epoch_embeds are the first half's rows of the same forward.
    emb, loss = fused_forward_ce(inputs, labels, w_feat, w_head)
    half = inputs.shape[0] // 2 if strong_augmentation else inputs.shape[0]
    noaug_embeds = emb[:half]                 # (half, D_pad), pad lanes are zero
    # TODO(synk): loss.backward() / optimizer.step() / scheduler.step(epoch) are
    # training-loop side effects with no Pallas equivalent; omitted.
    return noaug_embeds, loss


def dne_training_epoch(one_epoch_embeds, feat_dim, t=0):
    # one_epoch_embeds = cat(...); F.normalize; density.fit
    # Inputs may carry zero pad lanes beyond feat_dim; they drop out of mean/cov.
    mean_p, cov_p = normalize_and_fit(one_epoch_embeds)
    mean = mean_p[:feat_dim]
    cov = cov_p[:feat_dim, :feat_dim]
    # t == 0 path: for_eval_embeds == F.normalize(normalized embeds) == same rows,
    # so the second density.fit is identical -> reuse (L2 normalize is idempotent).
    # TODO(synk): np.random.multivariate_normal replay of past tasks (t > 0) is
    # host-side data synthesis, kept outside the kernel.
    return mean, cov, mean, cov


if __name__ == "__main__":
    key = jax.random.PRNGKey(0)
    k_x, k_lab, k_wf, k_wh = jax.random.split(key, 4)

    B, C, H, W = 16, 4, 16, 16      # inputs (NCHW); half of the batch is "no-strong-aug"
    D, NUM_CLASSES = 32, 8          # embedding dim, classifier classes

    inputs = jax.random.normal(k_x, (B, C, H, W), dtype=jnp.float32)
    labels = jax.random.randint(k_lab, (B,), 0, NUM_CLASSES)
    w_feat = jax.random.normal(k_wf, (C, D), dtype=jnp.float32) * 0.1
    w_head = jax.random.normal(k_wh, (D, NUM_CLASSES), dtype=jnp.float32) * 0.1

    noaug_embeds, loss = dne_forward(inputs, labels, w_feat, w_head)
    mean, cov, eval_mean, eval_cov = dne_training_epoch(noaug_embeds, feat_dim=D, t=0)

    jax.block_until_ready((noaug_embeds, loss, mean, cov, eval_mean, eval_cov))

    # ---- correctness checks -------------------------------------------------
    # Kernel A vs f32 reference (kernel runs the bf16 MXU path -> bf16 tolerances).
    pooled = inputs.reshape(B, C, H * W).mean(-1)
    emb_ref = pooled @ w_feat
    logits_ref = emb_ref @ w_head
    lse = jax.nn.logsumexp(logits_ref, axis=-1)
    loss_ref = jnp.mean(lse - logits_ref[jnp.arange(B), labels])
    np.testing.assert_allclose(np.asarray(loss), np.asarray(loss_ref),
                               rtol=5e-3, atol=5e-3)
    np.testing.assert_allclose(np.asarray(noaug_embeds[:, :D]),
                               np.asarray(emb_ref[: B // 2]),
                               rtol=2e-2, atol=2e-3)

    # Kernel B checked against the embeddings the kernel actually consumed (f32 path).
    xr = np.asarray(noaug_embeds[:, :D])
    xr = xr / np.maximum(np.linalg.norm(xr, axis=1, keepdims=True), 1e-12)
    mean_ref = xr.mean(0)
    cov_ref = (xr - mean_ref).T @ (xr - mean_ref) / (xr.shape[0] - 1)
    np.testing.assert_allclose(np.asarray(mean), mean_ref, rtol=1e-4, atol=1e-5)
    np.testing.assert_allclose(np.asarray(cov), cov_ref, rtol=1e-4, atol=1e-5)
    np.testing.assert_allclose(np.asarray(eval_cov), cov_ref, rtol=1e-4, atol=1e-5)

    print("KERNEL_OK")
</pallas_src>

<mosaic_0001>
module attributes {stable_mosaic.version = 11 : i64} {
  func.func @fused_forward_ce_kernel(%arg0: i32, %arg1: memref<8x1024xbf16, #tpu.memory_space<vmem>>, %arg2: memref<1024x128xbf16, #tpu.memory_space<vmem>>, %arg3: memref<128x128xbf16, #tpu.memory_space<vmem>>, %arg4: memref<1x128xf32, #tpu.memory_space<vmem>>, %arg5: memref<8x1xi32, #tpu.memory_space<vmem>>, %arg6: memref<8x128xf32, #tpu.memory_space<vmem>>, %arg7: memref<8x1xf32, #tpu.memory_space<vmem>>) attributes {dimension_semantics = [#tpu.dimension_semantics<parallel>], iteration_bounds = array<i64: 2>, scalar_prefetch = 0 : i64, scratch_operands = 0 : i64, tpu.core_type = #tpu.core_type<tc>, window_params = [{transform_indices = @transform_0, window_bounds = array<i64: 8, 1024>}, {pipeline_mode = #tpu.pipeline_mode<synchronous>, transform_indices = @transform_1, window_bounds = array<i64: 1024, 128>}, {pipeline_mode = #tpu.pipeline_mode<synchronous>, transform_indices = @transform_2, window_bounds = array<i64: 128, 128>}, {pipeline_mode = #tpu.pipeline_mode<synchronous>, transform_indices = @transform_3, window_bounds = array<i64: 1, 128>}, {transform_indices = @transform_4, window_bounds = array<i64: 8, 1>}, {transform_indices = @transform_5, window_bounds = array<i64: 8, 128>}, {transform_indices = @transform_6, window_bounds = array<i64: 8, 1>}]} {
    %c0 = arith.constant 0 : index
    %c0_0 = arith.constant 0 : index
    %0 = vector.load %arg1[%c0, %c0_0] : memref<8x1024xbf16, #tpu.memory_space<vmem>>, vector<8x1024xbf16>
    %c0_1 = arith.constant 0 : index
    %c0_2 = arith.constant 0 : index
    %1 = vector.load %arg2[%c0_1, %c0_2] : memref<1024x128xbf16, #tpu.memory_space<vmem>>, vector<1024x128xbf16>
    %cst = arith.constant dense<0.000000e+00> : vector<8x128xf32>
    %2 = tpu.matmul %0, %1, %cst {dimension_numbers = #tpu.dot_dimension_numbers<[1], [0], [0], [1], [0, 0, 1, 1], [], []>} : vector<8x1024xbf16>, vector<1024x128xbf16>, vector<8x128xf32> -> vector<8x128xf32>
    %c0_3 = arith.constant 0 : index
    %c0_4 = arith.constant 0 : index
    %3 = vector.load %arg6[%c0_3, %c0_4] : memref<8x128xf32, #tpu.memory_space<vmem>>, vector<8x128xf32>
    tpu.vector_store %arg6[%c0_3, %c0_4], %2 {strides = array<i32>} : memref<8x128xf32, #tpu.memory_space<vmem>>, vector<8x128xf32>,
    %4 = arith.truncf %2 : vector<8x128xf32> to vector<8x128xbf16>
    %c0_5 = arith.constant 0 : index
    %c0_6 = arith.constant 0 : index
    %5 = vector.load %arg3[%c0_5, %c0_6] : memref<128x128xbf16, #tpu.memory_space<vmem>>, vector<128x128xbf16>
    %cst_7 = arith.constant dense<0.000000e+00> : vector<8x128xf32>
    %6 = tpu.matmul %4, %5, %cst_7 {dimension_numbers = #tpu.dot_dimension_numbers<[1], [0], [0], [1], [0, 0, 1, 1], [], []>} : vector<8x128xbf16>, vector<128x128xbf16>, vector<8x128xf32> -> vector<8x128xf32>
    %c0_8 = arith.constant 0 : index
    %c0_9 = arith.constant 0 : index
    %7 = vector.load %arg4[%c0_8, %c0_9] : memref<1x128xf32, #tpu.memory_space<vmem>>, vector<1x128xf32>
    %8 = vector.broadcast %7 : vector<1x128xf32> to vector<8x128xf32>
    %9 = arith.addf %6, %8 : vector<8x128xf32>
    %cst_10 = arith.constant dense<0xFF800000> : vector<8xf32>
    %10 = vector.multi_reduction <maximumf>, %9, %cst_10 [1] : vector<8x128xf32> to vector<8xf32>
    %11 = vector.shape_cast %10 : vector<8xf32> to vector<8x1xf32>
    %12 = vector.broadcast %11 : vector<8x1xf32> to vector<8x128xf32>
    %13 = arith.subf %9, %12 : vector<8x128xf32>
    %14 = math.exp %13 : vector<8x128xf32>
    %cst_11 = arith.constant dense<0.000000e+00> : vector<8xf32>
    %15 = vector.multi_reduction <add>, %14, %cst_11 [1] : vector<8x128xf32> to vector<8xf32>
    %16 = vector.shape_cast %15 : vector<8xf32> to vector<8x1xf32>
    %17 = math.log %16 : vector<8x1xf32>
    %18 = arith.addf %17, %11 : vector<8x1xf32>
    %c0_12 = arith.constant 0 : index
    %c0_13 = arith.constant 0 : index
    %19 = vector.load %arg5[%c0_12, %c0_13] : memref<8x1xi32, #tpu.memory_space<vmem>>, vector<8x1xi32>
    %20 = tpu.iota {dimensions = array<i32: 1>} : vector<8x128xi32>
    %21 = vector.broadcast %19 : vector<8x1xi32> to vector<8x128xi32>
    %22 = arith.cmpi eq, %20, %21 : vector<8x128xi32>
    %cst_14 = arith.constant 0.000000e+00 : f32
    %23 = vector.broadcast %cst_14 : f32 to vector<8x128xf32>
    %24 = arith.select %22, %9, %23 : vector<8x128xi1>, vector<8x128xf32>
    %cst_15 = arith.constant dense<0.000000e+00> : vector<8xf32>
    %25 = vector.multi_reduction <add>, %24, %cst_15 [1] : vector<8x128xf32> to vector<8xf32>
    %26 = vector.shape_cast %25 : vector<8xf32> to vector<8x1xf32>
    %c0_i32 = arith.constant 0 : i32
    %27 = vector.broadcast %c0_i32 : i32 to vector<8x1xi32>
    %28 = arith.cmpi sge, %19, %27 : vector<8x1xi32>
    %29 = arith.subf %18, %26 : vector<8x1xf32>
    %cst_16 = arith.constant 0.000000e+00 : f32
    %30 = vector.broadcast %cst_16 : f32 to vector<8x1xf32>
    %31 = arith.select %28, %29, %30 : vector<8x1xi1>, vector<8x1xf32>
    %32 = vector.shape_cast %31 : vector<8x1xf32> to vector<1x8x1xf32>
    %cst_17 = arith.constant dense<0.000000e+00> : vector<1xf32>
    %33 = vector.multi_reduction <add>, %32, %cst_17 [1, 2] : vector<1x8x1xf32> to vector<1xf32>
    %34 = vector.shape_cast %33 : vector<1xf32> to vector<1x1x1xf32>
    %35 = vector.extract %34[0, 0, 0] : f32 from vector<1x1x1xf32>
    %36 = tpu.iota {dimensions = array<i32: 0>} : vector<8x1xi32>
    %c0_i32_18 = arith.constant 0 : i32
    %37 = vector.broadcast %c0_i32_18 : i32 to vector<8x1xi32>
    %38 = arith.cmpi eq, %36, %37 : vector<8x1xi32>
    %cst_19 = arith.constant 0.000000e+00 : f32
    %39 = vector.broadcast %35 : f32 to vector<8x1xf32>
    %40 = vector.broadcast %cst_19 : f32 to vector<8x1xf32>
    %41 = arith.select %38, %39, %40 : vector<8x1xi1>, vector<8x1xf32>
    %c0_20 = arith.constant 0 : index
    %c0_21 = arith.constant 0 : index
    %42 = vector.load %arg7[%c0_20, %c0_21] : memref<8x1xf32, #tpu.memory_space<vmem>>, vector<8x1xf32>
    tpu.vector_store %arg7[%c0_20, %c0_21], %41 {strides = array<i32>} : memref<8x1xf32, #tpu.memory_space<vmem>>, vector<8x1xf32>,
    return
  }
  func.func @transform_0(%arg0: i32) -> (i32, i32) {
    %c0_i32 = arith.constant 0 : i32
    %c0_i32_0 = arith.constant 0 : i32
    return %arg0, %c0_i32 : i32, i32
  }
  func.func @transform_1(%arg0: i32) -> (i32, i32) {
    %c0_i32 = arith.constant 0 : i32
    %c0_i32_0 = arith.constant 0 : i32
    %c0_i32_1 = arith.constant 0 : i32
    return %c0_i32, %c0_i32_0 : i32, i32
  }
  func.func @transform_2(%arg0: i32) -> (i32, i32) {
    %c0_i32 = arith.constant 0 : i32
    %c0_i32_0 = arith.constant 0 : i32
    %c0_i32_1 = arith.constant 0 : i32
    return %c0_i32, %c0_i32_0 : i32, i32
  }
  func.func @transform_3(%arg0: i32) -> (i32, i32) {
    %c0_i32 = arith.constant 0 : i32
    %c0_i32_0 = arith.constant 0 : i32
    %c0_i32_1 = arith.constant 0 : i32
    return %c0_i32, %c0_i32_0 : i32, i32
  }
  func.func @transform_4(%arg0: i32) -> (i32, i32) {
    %c0_i32 = arith.constant 0 : i32
    %c0_i32_0 = arith.constant 0 : i32
    return %arg0, %c0_i32 : i32, i32
  }
  func.func @transform_5(%arg0: i32) -> (i32, i32) {
    %c0_i32 = arith.constant 0 : i32
    %c0_i32_0 = arith.constant 0 : i32
    return %arg0, %c0_i32 : i32, i32
  }
  func.func @transform_6(%arg0: i32) -> (i32, i32) {
    %c0_i32 = arith.constant 0 : i32
    %c0_i32_0 = arith.constant 0 : i32
    return %arg0, %c0_i32 : i32, i32
  }
}

</mosaic_0001>

<bundles_post_ra>
// kernel: tpu_custom_call.1
= control target key start
LH: loop header
LB: loop body
LE: loop exit
PB: predicated region body
PF: predicated region fallthrough
CT: control target
= control target key end

     0   :  { %12 = vsyncpa [#allocation3], 0  ;;  %s2162_s0 = inlined_call_operand.hbm [shape: bf16[16,1024], index: 0, kind: input, shape index: {}]   ;;  %s2163_s1 = inlined_call_operand.hbm [shape: bf16[1024,128], index: 1, kind: input, shape index: {}]   ;;  %s2164_s2 = inlined_call_operand.hbm [shape: bf16[128,128], index: 2, kind: input, shape index: {}]   ;;  %s2165_s3 = inlined_call_operand.vmem [shape: f32[1,128], index: 3, kind: input, shape index: {}]   ;;  %s2166_s4 = inlined_call_operand.vmem [shape: s32[16,1], index: 4, kind: input, shape index: {}]   ;;  %s2167_s5 = inlined_call_operand.hbm [shape: f32[16,128], index: 5, kind: output, shape index: {0}]   ;;  %s2168_s6 = inlined_call_operand.vmem [shape: f32[16,1], index: 6, kind: output, shape index: {1}]  }
   0x1   :  { %14 = vsyncpa [#allocation3 + $0x1], 0 }
   0x2   :  { %15 = vsyncpa [#allocation6], 0 }
   0x3   :  { %16 = vsyncpa [#allocation4], 0 }
   0x4   :  { %18 = vsyncpa [#allocation4 + $0x1], 0  ;;  %s1908_s21 = smov 0   ;;  %s1910_s22 = smov 0  }
   0x5   :  { %s1912_s23 = smov 0   ;;  %s1914_s24 = smov 0  }
   0x6 LB: > { %s1929_s25 = sadd.s32 4294967295, %s1862_s24   ;;  %s1329_s26 = sadd.s32 4294967294, %s1862_s24   ;;  %s1862_s24 = sphi %s1914_s24, %s2188_s24   ;;  %s1858_s23 = sphi %s1912_s23, %s2187_s23   ;;  %s1854_s22 = sphi %s1910_s22, %s2186_s22   ;;  %s1850_s21 = sphi %s1908_s21, %s2185_s21  }
   0x7   : > { %p44_p0 = scmp.ne.s32.totalorder %s1854_s22, %s1850_s21  ;;  %p2169_p1 = scmp.eq.s32.totalorder %s1929_s25, 0 }
   0x8   : > { %p163_p3 = scmp.eq.s32.totalorder %s1329_s26, 1  ;;  %p1330_p5 = scmp.ge.s32.totalorder %s1862_s24, 1 }
   0x9   : > { %p1938_p4 = por %p2169_p1, %p44_p0  ;;  %p196_p7 = scmp.lt.s32.totalorder %s1862_s24, 3 }
   0xa   : > { %p1943_p6 = por %p163_p3, %p44_p0  ;;  %s1864_s30 = smov [#allocation5]  }
   0xb   : > { %s2172_s27 = scalar_select %p1938_p4, 1, 0 }
   0xc   : > { %s2173_s28 = scalar_select %p1943_p6, 1, 0 }
   0xd   : > { %p1948_p8 = pnand %p1330_p5, %p196_p7  ;;  %s208_s7 = sshll.u32 %s1864_s30, 4  ;;  %s1952_s7 = int_to_ptr.vmem [resolvable:$true] %s208_s7 }
   0xe   : > { %s1865_s9 = smov [#allocation7]   ;;  %s1706_s13 = scalar_lea.hbm %s2163_s1, 8192 }
   0xf   : > { %p1561_p9 = pneg %p1948_p8  ;;  %s221_s10 = sshll.u32 %s1865_s9, 4  ;;  %s1963_s10 = int_to_ptr.vmem [resolvable:$true] %s221_s10 }
  0x10   : > { %p1707_p12 = scmp.ne.s32.totalorder %s2163_s1, %s1706_s13  ;;  %p1713_p5 = scmp.lt.u32.totalorder %s1706_s13, %s2163_s1 }
  0x11   : > { %p1959_p11 = pnand %p1561_p9, %p2169_p1 }
  0x13   : > { %p1708_p13 = pneg %p1959_p11 }
  0x15   : > { %p1709_p0 = pnand %p1708_p13, %p1707_p12 }
  0x17   : > { %p1710_p3 = pneg %p1709_p0 }
  0x19   : > { %p1715_p7 = pnand %p1713_p5, %p1710_p3 }
  0x1b   : > { %1718 = shalt.err (!%p1715_p7)
}
  0x1c   : > { %s1719_s18 = scalar_lea.vmem %s1952_s7, 8192  ;;  %p1727_p2 = scmp.lt.s32.totalorder %s1952_s7, %s1952_s7 }
  0x1d   : > { %p1720_p9 = scmp.ne.s32.totalorder %s1952_s7, %s1719_s18  ;;  %p1728_p12 = scmp.lt.s32.totalorder %s1719_s18, %s1719_s18 }
  0x1f   : > { %p1722_p10 = pnand %p1720_p9, %p1708_p13  ;;  %p1729_p0 = por %p1728_p12, %p1727_p2 }
  0x21   : > { %p1723_p1 = pneg %p1722_p10 }
  0x23   : > { %p1730_p6 = pnand %p1729_p0, %p1723_p1 }
  0x25   : > { %1733 = shalt.err (!%p1730_p6)
}
  0x26   : > { %s1866_s19 = smov 64   ;;  %s1867_s20 = smov 4  }
  0x27   : > { %1564 = dma.hbm_to_vmem [thread:$0]  (!%p1959_p11), %s2163_s1, 8192, %s1952_s7, [#allocation6], %s1866_s19, %s1866_s19, %s1867_s20  }
  0x28   : > { %s1734_s12 = scalar_lea.hbm %s2164_s2, 1024 }
  0x29   : > { %p1735_p2 = scmp.ne.s32.totalorder %s2164_s2, %s1734_s12  ;;  %p1741_p10 = scmp.lt.u32.totalorder %s1734_s12, %s2164_s2 }
  0x2b   : > { %p1737_p1 = pnand %p1735_p2, %p1708_p13 }
  0x2d   : > { %p1738_p6 = pneg %p1737_p1 }
  0x2f   : > { %p1743_p3 = pnand %p1741_p10, %p1738_p6 }
  0x31   : > { %1746 = shalt.err (!%p1743_p3)
}
  0x32   : > { %s1747_s7 = scalar_lea.vmem %s1963_s10, 1024  ;;  %p1755_p12 = scmp.lt.s32.totalorder %s1963_s10, %s1963_s10 }
  0x33   : > { %p1748_p5 = scmp.ne.s32.totalorder %s1963_s10, %s1747_s7  ;;  %p1756_p0 = scmp.lt.s32.totalorder %s1747_s7, %s1747_s7 }
  0x35   : > { %p1750_p7 = pnand %p1748_p5, %p1708_p13  ;;  %p1757_p2 = por %p1756_p0, %p1755_p12 }
  0x37   : > { %p1751_p9 = pneg %p1750_p7 }
  0x39   : > { %p1758_p1 = pnand %p1757_p2, %p1751_p9 }
  0x3b   : > { %1761 = shalt.err (!%p1758_p1)
}
  0x3c   : > { %1567 = dma.hbm_to_vmem [thread:$0]  (!%p1959_p11), %s2164_s2, 1024, %s1963_s10, [#allocation6], %s1866_s19, %s1866_s19, %s1867_s20  }
  0x3d   : > { %s2018_s26 = sadd.s32 1, %s1862_s24   ;;  %s31_s8 = sadd.s32 1, %s1858_s23 }
  0x3e   : > { %s28_s30 = ssub.s32 %s1862_s24, %s2018_s26  ;;  %p38_p13 = scmp.ne.s32.totalorder %s1858_s23, %s1854_s22 }
  0x3f   : > { %p29_p6 = scmp.eq.s32.totalorder %s28_s30, 0  ;;  %p39_p10 = scmp.eq.s32.totalorder %s1862_s24, 0 }
  0x40   : > { %p2176_p3 = scmp.eq.s32.totalorder %s1929_s25, 1  ;;  %p1578_p7 = scmp.lt.s32.totalorder %s1862_s24, 2 }
  0x41   : > { %s2034_s11 = scalar_select %p29_p6, %s1858_s23, %s31_s8  }
  0x42   : > { %p2028_p5 = por %p2176_p3, %p38_p13  ;;  %p40_p9 = por %p39_p10, %p38_p13 }
  0x43   : > { %s238_s12 = sand.u32 1, %s1858_s23   ;;  %s1429_s10 = sshll.u32 %s1862_s24, 9 }
  0x44   : > { %s2177_s9 = scalar_select %p2028_p5, 1, 0 }
  0x45   : > { %s1334_s13 = sshll.u32 %s238_s12, 5  ;;  %s2041_s14 = scalar_lea.hbm %s2162_s0, %s1429_s10 }
  0x46   : > { %s242_s15 = scalar_lea.vmem [#allocation2], %s1334_s13  ;;  %p2045_p11 = pnand %p1578_p7, %p40_p9 }
  0x47   : > { %s250_s16 = sshll.u32 %s242_s15, 4  ;;  %s239_s17 = scalar_lea.sflag [#allocation3], %s238_s12  ;;  %s2043_s16 = int_to_ptr.vmem [resolvable:$true] %s250_s16 }
  0x48   : > { %s1762_s18 = scalar_lea.hbm %s2041_s14, 512  ;;  %p1764_p0 = pneg %p2045_p11 }
  0x49   : > { %p1763_p12 = scmp.ne.s32.totalorder %s2041_s14, %s1762_s18  ;;  %s1767_s13 = scalar_lea.hbm %s2162_s0, 1024 }
  0x4a   : > { %p1768_p13 = scmp.lt.u32.totalorder %s2041_s14, %s2162_s0  ;;  %p1769_p6 = scmp.lt.u32.totalorder %s1767_s13, %s1762_s18 }
  0x4b   : > { %p1765_p2 = pnand %p1764_p0, %p1763_p12  ;;  %p1771_p3 = scmp.lt.u32.totalorder %s1762_s18, %s2041_s14 }
  0x4c   : > { %p1770_p10 = por %p1769_p6, %p1768_p13 }
  0x4d   : > { %p1766_p1 = pneg %p1765_p2 }
  0x4e   : > { %p1772_p7 = por %p1771_p3, %p1770_p10 }
  0x50   : > { %p1773_p9 = pnand %p1772_p7, %p1766_p1 }
  0x52   : > { %1776 = shalt.err (!%p1773_p9)
}
  0x53   : > { %s1777_s12 = scalar_lea.vmem %s2043_s16, 512  ;;  %s1868_s20 = smov [#allocation2]  }
  0x54   : > { %p1778_p12 = scmp.ne.s32.totalorder %s2043_s16, %s1777_s12  ;;  %s1782_s15 = sshll.u32 %s1868_s20, 4  ;;  %s1783_s15 = int_to_ptr.vmem [resolvable:$false] %s1782_s15 }
  0x55   : > { %s1784_s8 = scalar_lea.vmem %s1783_s15, 1024  ;;  %p1785_p4 = scmp.lt.s32.totalorder %s2043_s16, %s1783_s15 }
  0x56   : > { %p1780_p2 = pnand %p1778_p12, %p1764_p0  ;;  %p1786_p13 = scmp.lt.s32.totalorder %s1784_s8, %s1777_s12 }
  0x58   : > { %p1781_p5 = pneg %p1780_p2  ;;  %p1787_p6 = por %p1786_p13, %p1785_p4 }
  0x5a   : > { %p1788_p10 = pnand %p1787_p6, %p1781_p5 }
  0x5c   : > { %1791 = shalt.err (!%p1788_p10)
}
  0x5d   : > { %1571 = dma.hbm_to_vmem [thread:$0]  (!%p2045_p11), %s2041_s14, 512, %s2043_s16, %s239_s17  }
  0x5e   : > { %266 = sbr.rel (%p1948_p8) target bundleno = 1131 (0x46b), region = 40  ;;  %s2077_s18 = sand.u32 (!%p1948_p8), 1, %s1854_s22  }
  0x5f   : > { %s1338_s30 = sshll.u32 (!%p1948_p8), %s2077_s18, 5  ;;  %s269_s13 = scalar_lea.sflag (!%p1948_p8), [#allocation3], %s2077_s18 }
  0x60   : > { %s2081_s10 = scalar_lea.vmem (!%p1948_p8), [#allocation2], %s1338_s30  ;;  %p2179_p4 = scmp.ne.s32.totalorder (!%p1948_p8), %s2172_s27, 0 }
  0x65   : > { %1837 = dma.done.wait (%p2179_p4), %s269_s13, 512  }
  0x66   : > { %1839 = vsyncadd (%p2179_p4), %s269_s13, 4294966784  ;;  %p2180_p5 = scmp.eq.s32.totalorder %s1929_s25, 0 }
  0x68   : > { %1841 = dma.done.wait (%p2180_p5), [#allocation6], 9216   ;;  %p2181_p8 = pmov %p2180_p5 }
  0x69   : > { %v1622_v0 = vld [vmem:[#allocation5 + $0x40] sm:$0xff]   ;;  %v1626_v4 = vld [vmem:[#allocation5 + $0x48] sm:$0xff]   ;;  %v1630_v8 = vld [vmem:[#allocation5 + $0x50] sm:$0xff]   ;;  %vm1870_vm0 = vmmov 0   ;;  %s1341_s27 = sshll.u32 %s2077_s18, 3  ;;  %p317_p11 = scmp.lt.s32.totalorder %s1929_s25, 1 }
  0x6a   : > { %1843 = vsyncadd (%p2181_p8), [#allocation6], 4294958080  ;;  %v1623_v1 = vld [vmem:[#allocation5 + $0xc0] sm:$0xff]   ;;  %1430 = vmatprep.subr.bf16.mxu0 %v1622_v0  ;;  %v1627_v5 = vld [vmem:[#allocation5 + $0xc8] sm:$0xff]   ;;  %s2096_s29 = scalar_lea.vmem [#allocation8], %s1341_s27  ;;  %vm1166_vm3 = vcmask 7168  }
  0x6b   : > { %v1624_v2 = vld [vmem:[#allocation5] sm:$0xff]   ;;  %1452 = vmatprep.subr.bf16.mxu1 %v1623_v1  ;;  %v1628_v6 = vld [vmem:[#allocation5 + $0x8] sm:$0xff]   ;;  %v1631_v9 = vld [vmem:[#allocation5 + $0xd0] sm:$0xff]   ;;  %s2104_s7 = scalar_select %p317_p11, %s1929_s25, 1 }
  0x6c   : > { %v1625_v3 = vld [vmem:[#allocation5 + $0x80] sm:$0xff]   ;;  %1431 = vmatpush3.bf16.msra.mxu0 %v1624_v2  ;;  %v1629_v7 = vld [vmem:[#allocation5 + $0x88] sm:$0xff]   ;;  %v1632_v10 = vld [vmem:[#allocation5 + $0x10] sm:$0xff]   ;;  %s1426_s15 = sshll.u32 %s1929_s25, 7  ;;  %s1201_s8 = sshll.u32 %s2096_s29, 4  ;;  %s1202_s8 = int_to_ptr.vmem [resolvable:$true] %s1201_s8 }
  0x6d   : > { %1453 = vmatpush3.bf16.msra.mxu1 %v1625_v3  ;;  %1432 = vmatprep.subr.bf16.mxu0 %v1626_v4  ;;  %v1633_v11 = vld [vmem:[#allocation5 + $0x90] sm:$0xff]   ;;  %v1634_v12 = vld [vmem:[#allocation5 + $0x58] sm:$0xff]   ;;  %v1638_v16 = vld [vmem:[#allocation5 + $0x60] sm:$0xff]   ;;  %s1342_s17 = sshll.u32 %s2104_s7, 3  ;;  %s1184_s27 = scalar_lea.sflag [#allocation4], %s2077_s18 }
  0x6e   : > { %1454 = vmatprep.subr.bf16.mxu1 %v1627_v5  ;;  %v1635_v13 = vld [vmem:[#allocation5 + $0xd8] sm:$0xff]   ;;  %v1639_v17 = vld [vmem:[#allocation5 + $0xe0] sm:$0xff]   ;;  %v1642_v20 = vld [vmem:[#allocation5 + $0x68] sm:$0xff]   ;;  %s320_s20 = scalar_lea.vmem %s2166_s4, %s1342_s17  ;;  %s1792_s14 = scalar_lea.vmem %s1202_s8, 128 }
  0x6f   : > { %v1636_v14 = vld [vmem:[#allocation5 + $0x18] sm:$0xff]   ;;  %v1640_v18 = vld [vmem:[#allocation5 + $0x20] sm:$0xff]   ;;  %v1643_v21 = vld [vmem:[#allocation5 + $0xe8] sm:$0xff]   ;;  %p1793_p0 = scmp.ne.s32.totalorder %s1202_s8, %s1792_s14  ;;  %p2182_p1 = scmp.ne.s32.totalorder %s2177_s9, 0 }
  0x70   : > { %1433 = vmatpush3.bf16.msra.mxu0 %v1628_v6  ;;  %v1637_v15 = vld [vmem:[#allocation5 + $0x98] sm:$0xff]   ;;  %v1641_v19 = vld [vmem:[#allocation5 + $0xa0] sm:$0xff]   ;;  %v1644_v22 = vld [vmem:[#allocation5 + $0x28] sm:$0xff]   ;;  %s1872_s16 = smov [#allocation8]  }
  0x71   : > { %1455 = vmatpush3.bf16.msra.mxu1 %v1629_v7  ;;  %1434 = vmatprep.subr.bf16.mxu0 %v1630_v8  ;;  %v1645_v23 = vld [vmem:[#allocation5 + $0xa8] sm:$0xff]   ;;  %v1646_v24 = vld [vmem:[#allocation5 + $0x70] sm:$0xff]   ;;  %v1650_v28 = vld [vmem:[#allocation5 + $0x78] sm:$0xff]   ;;  %p1794_p3 = pnand %p1793_p0, %p2182_p1  ;;  %s1796_s19 = sshll.u32 %s1872_s16, 4  ;;  %s1797_s19 = int_to_ptr.vmem [resolvable:$false] %s1796_s19 }
  0x72   : > { %1456 = vmatprep.subr.bf16.mxu1 %v1631_v9  ;;  %v1647_v25 = vld [vmem:[#allocation5 + $0xf0] sm:$0xff]   ;;  %v1651_v29 = vld [vmem:[#allocation5 + $0xf8] sm:$0xff]   ;;  %v326_v32 = vld [vmem:[%s2081_s10] sm:$0xff]  ;;  %s1798_s12 = scalar_lea.vmem %s1797_s19, 256  ;;  %p1799_p9 = scmp.lt.s32.totalorder %s1202_s8, %s1797_s19 }
  0x73   : > { %v1648_v26 = vld [vmem:[#allocation5 + $0x30] sm:$0xff]   ;;  %v1652_v30 = vld [vmem:[#allocation5 + $0x38] sm:$0xff]   ;;  %v327_v33 = vld [vmem:[%s2081_s10 + $0x8] sm:$0xff]  ;;  %v1344_v34 = vcombine.low %v326_v32, %v326_v32  ;;  %v1345_v35 = vcombine.high %v326_v32, %v326_v32  ;;  %p1795_p7 = pneg %p1794_p3  ;;  %p1800_p12 = scmp.lt.s32.totalorder %s1798_s12, %s1792_s14 }
  0x74   : > { %1435 = vmatpush3.bf16.msra.mxu0 %v1632_v10  ;;  %v1649_v27 = vld [vmem:[#allocation5 + $0xb0] sm:$0xff]   ;;  %v1653_v31 = vld [vmem:[#allocation5 + $0xb8] sm:$0xff]   ;;  %v1346_v36 = vcombine.low %v327_v33, %v327_v33  ;;  %v1347_v37 = vcombine.high %v327_v33, %v327_v33  ;;  %v1658_v38 = vld [vmem:[#allocation5 + $0x140] sm:$0xff]  }
  0x75   : > { %1457 = vmatpush3.bf16.msra.mxu1 %v1633_v11  ;;  %1436 = vmatprep.subr.bf16.mxu0 %v1634_v12  ;;  %v1659_v39 = vld [vmem:[#allocation5 + $0x1c0] sm:$0xff]   ;;  %v1662_v42 = vld [vmem:[#allocation5 + $0x148] sm:$0xff]   ;;  %v1666_v46 = vld [vmem:[#allocation5 + $0x150] sm:$0xff]   ;;  %p1801_p2 = por %p1800_p12, %p1799_p9 }
  0x76   : > { %1458 = vmatprep.subr.bf16.mxu1 %v1635_v13  ;;  %902 = vmatprep.mubr.bf16.mxu0 %v1345_v35  ;;  %v1660_v40 = vld [vmem:[#allocation5 + $0x100] sm:$0xff]   ;;  %v1663_v43 = vld [vmem:[#allocation5 + $0x1c8] sm:$0xff]   ;;  %v1667_v47 = vld [vmem:[#allocation5 + $0x1d0] sm:$0xff]   ;;  %v1869_v13 = vmov 0.0  }
  0x77   : > { %942 = vmatprep.mubr.bf16.mxu1 %v1347_v37  ;;  %v1661_v41 = vld [vmem:[#allocation5 + $0x180] sm:$0xff]   ;;  %v1664_v44 = vld [vmem:[#allocation5 + $0x108] sm:$0xff]   ;;  %v1668_v48 = vld [vmem:[#allocation5 + $0x110] sm:$0xff]   ;;  %p1802_p13 = pnand %p1801_p2, %p1795_p7 }
  0x78   : > { %1437 = vmatpush3.bf16.msra.mxu0 %v1636_v14  ;;  %v1665_v45 = vld [vmem:[#allocation5 + $0x188] sm:$0xff]   ;;  %v1669_v49 = vld [vmem:[#allocation5 + $0x190] sm:$0xff]   ;;  %v1670_v50 = vld [vmem:[#allocation5 + $0x158] sm:$0xff]  }
  0x79   : > { %1459 = vmatpush3.bf16.msra.mxu1 %v1637_v15  ;;  %1438 = vmatprep.subr.bf16.mxu0 %v1638_v16  ;;  %v1671_v51 = vld [vmem:[#allocation5 + $0x1d8] sm:$0xff]   ;;  %v1674_v54 = vld [vmem:[#allocation5 + $0x160] sm:$0xff]   ;;  %v1678_v58 = vld [vmem:[#allocation5 + $0x168] sm:$0xff]  }
  0x7a   : > { %1460 = vmatprep.subr.bf16.mxu1 %v1639_v17  ;;  %v1672_v52 = vld [vmem:[#allocation5 + $0x118] sm:$0xff]   ;;  %v1675_v55 = vld [vmem:[#allocation5 + $0x1e0] sm:$0xff]   ;;  %v1679_v59 = vld [vmem:[#allocation5 + $0x1e8] sm:$0xff]  }
  0x7b   : > { %v1673_v53 = vld [vmem:[#allocation5 + $0x198] sm:$0xff]   ;;  %v1676_v56 = vld [vmem:[#allocation5 + $0x120] sm:$0xff]   ;;  %v1680_v60 = vld [vmem:[#allocation5 + $0x128] sm:$0xff]  }
  0x7c   : > { %1439 = vmatpush3.bf16.msra.mxu0 %v1640_v18  ;;  %v1677_v57 = vld [vmem:[#allocation5 + $0x1a0] sm:$0xff]   ;;  %v1681_v61 = vld [vmem:[#allocation5 + $0x1a8] sm:$0xff]   ;;  %v1682_v62 = vld [vmem:[#allocation5 + $0x170] sm:$0xff]  }
  0x7d   : > { %1461 = vmatpush3.bf16.msra.mxu1 %v1641_v19  ;;  %1440 = vmatprep.subr.bf16.mxu0 %v1642_v20  ;;  %v1683_v63 = vld [vmem:[#allocation5 + $0x1f0] sm:$0xff]   ;;  %v1686_v2 = vld [vmem:[#allocation5 + $0x178] sm:$0xff]   ;;  %v1694_v12 = vld [vmem:[#allocation7] sm:$0xff]  }
  0x7e   : > { %1462 = vmatprep.subr.bf16.mxu1 %v1643_v21  ;;  %v1684_v0 = vld [vmem:[#allocation5 + $0x130] sm:$0xff]   ;;  %v1687_v3 = vld [vmem:[#allocation5 + $0x1f8] sm:$0xff]   ;;  %v1695_v14 = vld [vmem:[#allocation7 + $0x8] sm:$0xff]  }
  0x7f   : > { %v1685_v1 = vld [vmem:[#allocation5 + $0x1b0] sm:$0xff]   ;;  %v1688_v4 = vld [vmem:[#allocation5 + $0x138] sm:$0xff]   ;;  %v1698_v17 = vld [vmem:[#allocation7 + $0x20] sm:$0xff]  }
  0x80   : > { %1441 = vmatpush3.bf16.msra.mxu0 %v1644_v22  ;;  %v1689_v5 = vld [vmem:[#allocation5 + $0x1b8] sm:$0xff]   ;;  %v328_v6 = vld [vmem:[%s2081_s10 + $0x10] sm:$0xff]  ;;  %v1699_v18 = vld [vmem:[#allocation7 + $0x28] sm:$0xff]  }
  0x81   : > { %1463 = vmatpush3.bf16.msra.mxu1 %v1645_v23  ;;  %1442 = vmatprep.subr.bf16.mxu0 %v1646_v24  ;;  %v1348_v7 = vcombine.low %v328_v6, %v328_v6  ;;  %v1349_v8 = vcombine.high %v328_v6, %v328_v6  ;;  %v329_v9 = vld [vmem:[%s2081_s10 + $0x18] sm:$0xff]  ;;  %v1696_v15 = vld [vmem:[#allocation7 + $0x10] sm:$0xff]   ;;  %s2118_s10 = scalar_lea.hbm %s2167_s5, %s1426_s15 }
  0x82   : > { %1464 = vmatprep.subr.bf16.mxu1 %v1647_v25  ;;  %v1350_v10 = vcombine.low %v329_v9, %v329_v9  ;;  %v1351_v11 = vcombine.high %v329_v9, %v329_v9  ;;  %v1697_v16 = vld [vmem:[#allocation7 + $0x18] sm:$0xff]   ;;  %v1700_v19 = vld [vmem:[#allocation7 + $0x30] sm:$0xff]  }
  0x83   : > { %v1701_v20 = vld [vmem:[#allocation7 + $0x38] sm:$0xff]  }
  0x84   : > { %1443 = vmatpush3.bf16.msra.mxu0 %v1648_v26 }
  0x85   : > { %1465 = vmatpush3.bf16.msra.mxu1 %v1649_v27  ;;  %1444 = vmatprep.subr.bf16.mxu0 %v1650_v28 }
  0x86   : > { %1466 = vmatprep.subr.bf16.mxu1 %v1651_v29 }
  0x88   : > { %1445 = vmatpush3.bf16.msra.mxu0 %v1652_v30 }
  0x89   : > { %1467 = vmatpush3.bf16.msra.mxu1 %v1653_v31  ;;  %1474 = vmatprep.subr.bf16.mxu0 %v1658_v38 }
  0x8a   : > { %1496 = vmatprep.subr.bf16.mxu1 %v1659_v39 }
  0x8b   : > { %903 = vmatmul.mubr.bf16.vlgmr.msra.gmra.mrb[0].mxu0 %v1344_v34 }
  0x8c   : > { %943 = vmatmul.mubr.bf16.vlgmr.msra.gmra.mrb[0].mxu1 %v1346_v36  ;;  %1475 = vmatpush3.bf16.msra.mxu0 %v1660_v40 }
  0x8d   : > { %1497 = vmatpush3.bf16.msra.mxu1 %v1661_v41  ;;  %1476 = vmatprep.subr.bf16.mxu0 %v1662_v42 }
  0x8e   : > { %1498 = vmatprep.subr.bf16.mxu1 %v1663_v43  ;;  %982 = vmatprep.mubr.bf16.mxu0 %v1349_v8 }
  0x8f   : > { %1022 = vmatprep.mubr.bf16.mxu1 %v1351_v11 }
  0x90   : > { %1477 = vmatpush3.bf16.msra.mxu0 %v1664_v44 }
  0x91   : > { %1499 = vmatpush3.bf16.msra.mxu1 %v1665_v45  ;;  %1478 = vmatprep.subr.bf16.mxu0 %v1666_v46  ;;  %v1871_v45 = vmov 0   ;;  %v1416_v46 = vld [vmem:[%s2165_s3] ss:$0 sm:$0xff] }
  0x92   : > { %1500 = vmatprep.subr.bf16.mxu1 %v1667_v47  ;;  %1621 = vset.pattern.permute.xlu0 %v1871_v45 }
  0x94   : > { %1479 = vmatpush3.bf16.msra.mxu0 %v1668_v48 }
  0x95   : > { %1501 = vmatpush3.bf16.msra.mxu1 %v1669_v49  ;;  %1480 = vmatprep.subr.bf16.mxu0 %v1670_v50 }
  0x96   : > { %1502 = vmatprep.subr.bf16.mxu1 %v1671_v51 }
  0x98   : > { %1481 = vmatpush3.bf16.msra.mxu0 %v1672_v52  ;;  %v1153_v52 = vld [vmem:[%s320_s20] sm:$0xff] }
  0x99   : > { %1503 = vmatpush3.bf16.msra.mxu1 %v1673_v53  ;;  %1482 = vmatprep.subr.bf16.mxu0 %v1674_v54  ;;  %vm1163_vm2 = vcmp.ge.s32.totalorder %v1153_v52, 0 }
  0x9a   : > { %1504 = vmatprep.subr.bf16.mxu1 %v1675_v55 }
  0x9c   : > { %1483 = vmatpush3.bf16.msra.mxu0 %v1676_v56  ;;  %v1154_v56 = vlaneseq }
  0x9d   : > { %1505 = vmatpush3.bf16.msra.mxu1 %v1677_v57  ;;  %1484 = vmatprep.subr.bf16.mxu0 %v1678_v58 }
  0x9e   : > { %1506 = vmatprep.subr.bf16.mxu1 %v1679_v59  ;;  %v1155_v57 = vand.u32 127, %v1154_v56 }
  0xa0   : > { %1485 = vmatpush3.bf16.msra.mxu0 %v1680_v60 }
  0xa1   : > { %1507 = vmatpush3.bf16.msra.mxu1 %v1681_v61  ;;  %1486 = vmatprep.subr.bf16.mxu0 %v1682_v62 }
  0xa2   : > { %1508 = vmatprep.subr.bf16.mxu1 %v1683_v63 }
  0xa4   : > { %1487 = vmatpush3.bf16.msra.mxu0 %v1684_v0 }
  0xa5   : > { %1509 = vmatpush3.bf16.msra.mxu1 %v1685_v1  ;;  %1488 = vmatprep.subr.bf16.mxu0 %v1686_v2 }
  0xa6   : > { %1510 = vmatprep.subr.bf16.mxu1 %v1687_v3 }
  0xa8   : > { %1489 = vmatpush3.bf16.msra.mxu0 %v1688_v4 }
  0xa9   : > { %1511 = vmatpush3.bf16.msra.mxu1 %v1689_v5  ;;  %1527 = vmatprep.subr.bf16.mxu0 %v1869_v13 }
  0xab   : > { %983 = vmatmul.mubr.bf16.vlgmr.msra.gmra.mrb[4].mxu0 %v1348_v7 }
  0xac   : > { %1023 = vmatmul.mubr.bf16.vlgmr.msra.gmra.mrb[4].mxu1 %v1350_v10  ;;  %1528 = vmatpush3.bf16.msra.mxu0 %v1694_v12 }
  0xad   : > { %1529 = vmatprep.subr.bf16.mxu0 %v1869_v13  ;;  %1543 = vmatprep.mubr.msk.bf16.mxu0 %vm1870_vm0, %v1869_v13 }
  0xb0   : > { %1530 = vmatpush3.bf16.msra.mxu0 %v1695_v14 }
  0xb1   : > { %1531 = vmatprep.subr.bf16.mxu0 %v1869_v13 }
  0xb4   : > { %1532 = vmatpush3.bf16.msra.mxu0 %v1696_v15 }
  0xb5   : > { %1533 = vmatprep.subr.bf16.mxu0 %v1869_v13 }
  0xb8   : > { %1534 = vmatpush3.bf16.msra.mxu0 %v1697_v16 }
  0xb9   : > { %1535 = vmatprep.subr.bf16.mxu0 %v1869_v13 }
  0xbc   : > { %1536 = vmatpush3.bf16.msra.mxu0 %v1698_v17 }
  0xbd   : > { %1537 = vmatprep.subr.bf16.mxu0 %v1869_v13 }
  0xc0   : > { %1538 = vmatpush3.bf16.msra.mxu0 %v1699_v18 }
  0xc1   : > { %1539 = vmatprep.subr.bf16.mxu0 %v1869_v13 }
  0xc4   : > { %1540 = vmatpush3.bf16.msra.mxu0 %v1700_v19 }
  0xc5   : > { %1541 = vmatprep.subr.bf16.mxu0 %v1869_v13 }
  0xc8   : > { %1542 = vmatpush3.bf16.msra.mxu0 %v1701_v20 }
 0x15e   : > { %v1446_v21 = vpop.f32.mrb[0].mxu0 }
 0x15f   : > { %v1468_v22 = vpop.f32.mrb[0].mxu1  ;;  %v1447_v23 = vpop.f32.mrb[1].mxu0 }
 0x160   : > { %v1469_v24 = vpop.f32.mrb[1].mxu1  ;;  %v1448_v25 = vadd.f32 %v1447_v23, %v1446_v21  ;;  %v1449_v27 = vpop.f32.mrb[2].mxu0 }
 0x161   : > { %v1470_v26 = vadd.f32 %v1469_v24, %v1468_v22  ;;  %v1471_v28 = vpop.f32.mrb[2].mxu1  ;;  %v1450_v29 = vpop.f32.mrb[3].mxu0 }
 0x162   : > { %v1472_v30 = vpop.f32.mrb[3].mxu1 }
 0x163   : > { %v945_v31 = vadd.f32 %v1470_v26, %v1448_v25 }
 0x17e   : > { %v1490_v32 = vpop.f32.mrb[4].mxu0 }
 0x17f   : > { %v1512_v33 = vpop.f32.mrb[4].mxu1  ;;  %v1491_v34 = vpop.f32.mrb[5].mxu0 }
 0x180   : > { %v1513_v35 = vpop.f32.mrb[5].mxu1  ;;  %v1492_v36 = vadd.f32 %v1491_v34, %v1490_v32  ;;  %v1493_v38 = vpop.f32.mrb[6].mxu0 }
 0x181   : > { %v1514_v37 = vadd.f32 %v1513_v35, %v1512_v33  ;;  %v1515_v39 = vpop.f32.mrb[6].mxu1  ;;  %v1494_v40 = vpop.f32.mrb[7].mxu0 }
 0x182   : > { %v1516_v41 = vpop.f32.mrb[7].mxu1  ;;  %v985_v42 = vadd.f32 %v1492_v36, %v945_v31 }
 0x184   : > { %v1025_v43 = vadd.f32 %v1514_v37, %v985_v42 }
 0x186   : > { %v1031_v44 = vpack.c.bf16 %v1025_v43, %v1025_v43  ;;  %1030 = vst [vmem:[%s2096_s29] sm:$0xff] %v1025_v43 }
 0x188   : > { %1544 = vmatmul.mubr.bf16.vlgmr.msra.gmra.mrb[8].mxu0 %v1031_v44 }
 0x25b   : > { %v1137_v47 = vpop.f32.mrb[8].mxu0 }
 0x25c   : > { %v1138_v48 = vadd.f32 %v1416_v46, %v1137_v47  ;;  %v1545_v49 = vpop.f32.mrb[9].mxu0 }
 0x25d   : > { %v1140_v50 = vpop.f32.mrb[10].mxu0 }
 0x25e   : > { %1143 = vmax.xlane.f32.xlu0 %v1138_v48  ;;  %v1546_v51 = vpop.f32.mrb[11].mxu0 }
 0x274   : > { %1157 = vperm.xlu0 %1621, %v1153_v52  }
 0x2eb   : > { %v1144_v53 = vpop.xlane.xlu0 %1143 }
 0x2ec   : > { %v1145_v54 = vsub.f32 %v1138_v48, %v1144_v53 }
 0x2ee   : > { %v1146_v55 = vmul.f32 1.442695, %v1145_v54 }
 0x2f0   : > { %1702 = vpow2.f32 %v1146_v55 }
 0x2f3   : > { %v1158_v58 = vpop.permute.xlu0 %1157 }
 0x2f4   : > { %vm1159_vm1 = vcmp.eq.s32.totalorder %v1155_v57, %v1158_v58 }
 0x2f5   : > { %v1160_v60 = vsel %vm1159_vm1, %v1138_v48, 0.0 }
 0x2fa   : > { %v1703_v59 = vpop.eup %1702 }
 0x2fb   : > { %1148 = vadd.xlane.f32.xlu1 %v1703_v59 }
 0x2ff   : > { %1161 = vadd.xlane.f32.xlu1 %v1160_v60 }
 0x388   : > { %v1149_v61 = vpop.xlane.xlu1 %1148 }
 0x389   : > { %1704 = vlog2.f32 %v1149_v61 }
 0x38c   : > { %v1162_v1 = vpop.xlane.xlu1 %1161 }
 0x393   : > { %v1705_v62 = vpop.eup %1704 }
 0x394   : > { %v1151_v63 = vmul.f32 0.6931472, %v1705_v62 }
 0x396   : > { %v1152_v0 = vadd.f32 %v1151_v63, %v1144_v53 }
 0x398   : > { %v1164_v2 = vsub.f32 %v1152_v0, %v1162_v1 }
 0x39a   : > { %v1165_v3 = vsel %vm1163_vm2, %v1164_v2, 0.0 }
 0x39b   : > { %v1167_v4 = vsel %vm1166_vm3, %v1165_v3, 0.0 }
 0x39c   : > { %1168 = vadd.xlane.f32.xlu1 %v1167_v4 }
 0x39d   : > { %1805 = shalt.err (!%p1802_p13)
}
 0x39e   : > { %s1806_s25 = scalar_lea.hbm %s2118_s10, 128  ;;  %s1810_s20 = scalar_lea.hbm %s2167_s5, 256 }
 0x39f   : > { %p1807_p6 = scmp.ne.s32.totalorder %s2118_s10, %s1806_s25  ;;  %p1811_p5 = scmp.lt.u32.totalorder %s2118_s10, %s2167_s5 }
 0x3a0   : > { %p1812_p8 = scmp.lt.u32.totalorder %s1810_s20, %s1806_s25  ;;  %p1814_p0 = scmp.lt.u32.totalorder %s1806_s25, %s2118_s10 }
 0x3a1   : > { %p1808_p10 = pnand %p1807_p6, %p2182_p1 }
 0x3a2   : > { %p1813_p11 = por %p1812_p8, %p1811_p5 }
 0x3a3   : > { %p1809_p4 = pneg %p1808_p10 }
 0x3a4   : > { %p1815_p3 = por %p1814_p0, %p1813_p11 }
 0x3a6   : > { %p1816_p7 = pnand %p1815_p3, %p1809_p4 }
 0x3a8   : > { %1819 = shalt.err (!%p1816_p7)
}
 0x3a9   : > { %1559 = dma.vmem_to_hbm [thread:$0]  (%p2182_p1), %s1202_s8, 128, %s2118_s10, %s1184_s27   ;;  %v1178_v12 = vshrl.u32 %v1154_v56, 7 }
 0x3aa   : > { %s324_s16 = scalar_lea.vmem %s2168_s6, %s1342_s17 }
 0x3ab   : > { %vm1179_vm4 = vcmp.eq.s32.totalorder %v1178_v12, 0 }
 0x429   : > { %v1169_v5 = vpop.xlane.xlu1 %1168 }
 0x42a   : > { %v1170_v6 = vrot.slane %v1169_v5, 4 }
 0x42c   : > { %v1171_v7 = vadd.f32 %v1170_v6, %v1169_v5 }
 0x42e   : > { %v1172_v8 = vrot.slane %v1171_v7, 2 }
 0x430   : > { %v1173_v9 = vadd.f32 %v1172_v8, %v1171_v7 }
 0x432   : > { %v1174_v10 = vrot.slane %v1173_v9, 1 }
 0x434   : > { %v1175_v11 = vadd.f32 %v1174_v10, %v1173_v9 }
 0x436   : > { %1547 = vpush %v1175_v11 }
 0x467   : > { %s1548_s19 = spop %1547 }
 0x468   : > { %v1180_v13 = vstv %s1548_s19 }
 0x469   : > { %v1181_v14 = vsel %vm1179_vm4, %v1180_v13, 0.0 }
 0x46a   : > { %1182 = vst.msk [vmem:[%s324_s16] sm:$0xff] %vm1166_vm3, %v1181_v14 }
 0x46b PF: > { %s1216_s9 = sand.u32 1, %s1850_s21   ;;  %p2183_p1 = scmp.ne.s32.totalorder %s2173_s28, 0 }
 0x46c   : > { %p2184_p9 = scmp.ge.s32.totalorder %s1862_s24, 2  ;;  %s1217_s8 = scalar_lea.sflag [#allocation4], %s1216_s9 }
 0x46e   : > { %p1573_p12 = pnand %p2184_p9, %p2183_p1 }
 0x470   : > { %1845 = dma.done.wait (!%p1573_p12), %s1217_s8, 128  }
 0x471   : > { %1847 = vsyncadd (!%p1573_p12), %s1217_s8, 4294967168  ;;  %p21_p2 = scmp.ge.s32.totalorder %s2018_s26, 4   ;;  %s2185_s21 = smov %s1854_s22 }
 0x472   : > { %s2186_s22 = smov %s1858_s23  ;;  %s2187_s23 = smov %s2034_s11 }
 0x473   : > { %s2188_s24 = smov %s2018_s26  ;;  %23 = sbr.rel (!%p21_p2) target bundleno = 6 (0x6), region = 108 }
 0x47a   :  { %1229 = vsyncpa [#allocation3], 1 }
 0x47b   :  { %1231 = vsyncpa [#allocation3 + $0x1], 1 }
 0x47c   :  { %1232 = vsyncpa [#allocation6], 1 }
 0x47d   :  { %1233 = vsyncpa [#allocation4], 1 }
 0x47e   :  { %1235 = vsyncpa [#allocation4 + $0x1], 1 }

</bundles_post_ra>
